<compile_context>
chip_gen: v7x
topology: tpu7x:2x2x1
jax: 0.10.0
libtpu: 0.0.40
codegen_flags: <defaults>
</compile_context>

<pallas_src>
import functools

import jax
import jax.numpy as jnp
from jax.experimental import pallas as pl
from jax.experimental.pallas import tpu as pltpu


def mlp_kernel(params_ref, xt_ref, o_ref):
    """One batch tile, batch packed densely over (sublane, lane).

    params_ref : (17,) SMEM  -- [w1 (4x2 row-major, 8), b1 (4), w2 (4), b2 (1)]
    xt_ref     : (2, ROWS, 128) VMEM -- input features, batch on (rows, lanes)
    o_ref      : (ROWS, 128)    VMEM -- sigmoid output
    """
    x0 = xt_ref[0]                      # (ROWS, 128) dense vregs
    x1 = xt_ref[1]                      # (ROWS, 128)

    # fc2 bias as the accumulator init (no zeros+add).
    z = jnp.full_like(x0, params_ref[16])

    # fc1 + ReLU + fc2 accumulation, fully unrolled over 4 hidden units.
    for j in range(4):
        h = x0 * params_ref[2 * j] + x1 * params_ref[2 * j + 1] + params_ref[8 + j]
        h = jnp.maximum(h, 0.0)
        z = z + h * params_ref[12 + j]

    # sigmoid(z) = 1 / (1 + exp(-z)); exp and reciprocal both on the EUP slot.
    sig = pl.reciprocal(1.0 + jnp.exp(-z), approx=True)
    o_ref[...] = sig.astype(o_ref.dtype)


@functools.partial(jax.jit, static_argnames=("rows_tile",))
def neural_network_forward(x, w1, b1, w2, b2, *, rows_tile=2048):
    """x: (B, 2) float32. Params in PyTorch nn.Linear layout:
       w1 (4, 2), b1 (4,), w2 (1, 4), b2 (1,). Returns (B, 1) float32."""
    B = x.shape[0]

    # Dense (rows, 128) batch packing; rows tile must be a multiple of 8.
    rows_needed = pl.cdiv(B, 128)
    rt = max(8, (rows_tile // 8) * 8)
    rt = min(rt, pl.cdiv(rows_needed, 8) * 8)      # shrink tile for small B
    rows_padded = pl.cdiv(rows_needed, rt) * rt
    Bp = rows_padded * 128

    # Single pad + transpose + reshape to the dense kernel layout.
    xt = jnp.pad(x.astype(jnp.float32), ((0, Bp - B), (0, 0))).T
    xt = xt.reshape(2, rows_padded, 128)

    # All 17 parameter scalars in one resident SMEM array.
    params = jnp.concatenate(
        [w1.reshape(-1), b1.reshape(-1), w2.reshape(-1), b2.reshape(-1)]
    ).astype(jnp.float32)

    out = pl.pallas_call(
        mlp_kernel,
        out_shape=jax.ShapeDtypeStruct((rows_padded, 128), jnp.float32),
        grid_spec=pltpu.PrefetchScalarGridSpec(
            num_scalar_prefetch=0,
            grid=(rows_padded // rt,),
            in_specs=[
                pl.BlockSpec(memory_space=pltpu.MemorySpace.SMEM),   # params
                pl.BlockSpec((2, rt, 128), lambda i: (0, i, 0)),     # x^T tile
            ],
            out_specs=pl.BlockSpec((rt, 128), lambda i: (i, 0)),
        ),
        compiler_params=pltpu.CompilerParams(
            dimension_semantics=("parallel",),   # dual-TC sharding on v7x
        ),
    )(params, xt)

    return out.reshape(Bp)[:B].reshape(B, 1)


def init_params(key):
    # PyTorch nn.Linear shapes: fc1 weight (4, 2), bias (4,); fc2 weight (1, 4), bias (1,).
    k1, k2, k3, k4 = jax.random.split(key, 4)
    w1 = jax.random.uniform(k1, (4, 2), jnp.float32, -0.5, 0.5)
    b1 = jax.random.uniform(k2, (4,), jnp.float32, -0.5, 0.5)
    w2 = jax.random.uniform(k3, (1, 4), jnp.float32, -0.5, 0.5)
    b2 = jax.random.uniform(k4, (1,), jnp.float32, -0.5, 0.5)
    return w1, b1, w2, b2


def _ref_forward(x, w1, b1, w2, b2):
    # Reference: torch semantics y = sigmoid(relu(x @ W1^T + b1) @ W2^T + b2)
    return jax.nn.sigmoid(jnp.maximum(x @ w1.T + b1, 0.0) @ w2.T + b2)


if __name__ == "__main__":
    key = jax.random.PRNGKey(0)
    k_x, k_p, k_x2 = jax.random.split(key, 3)
    w1, b1, w2, b2 = init_params(k_p)

    # Case 1: small, non-multiple-of-128 batch (exercises pad + slice).
    B = 200
    x = jax.random.normal(k_x, (B, 2), jnp.float32)
    out = jax.block_until_ready(neural_network_forward(x, w1, b1, w2, b2))
    ref = _ref_forward(x, w1, b1, w2, b2)
    assert out.shape == (B, 1)
    # approx reciprocal in the sigmoid -> ~1e-4 abs error; use 2e-3 tolerance.
    assert jnp.allclose(out, ref, atol=2e-3), "mismatch vs reference (case 1)"

    # Case 2: small rows_tile to exercise a multi-tile grid.
    B2 = 2000
    x2 = jax.random.normal(k_x2, (B2, 2), jnp.float32)
    out2 = jax.block_until_ready(
        neural_network_forward(x2, w1, b1, w2, b2, rows_tile=8)
    )
    ref2 = _ref_forward(x2, w1, b1, w2, b2)
    assert out2.shape == (B2, 1)
    assert jnp.allclose(out2, ref2, atol=2e-3), "mismatch vs reference (case 2)"

    print("KERNEL_OK")
</pallas_src>

<mosaic_0001>
module attributes {stable_mosaic.version = 11 : i64} {
  func.func @mlp_kernel(%arg0: i32, %arg1: memref<17xf32, #tpu.memory_space<smem>>, %arg2: memref<2x8x128xf32, #tpu.memory_space<vmem>>, %arg3: memref<8x128xf32, #tpu.memory_space<vmem>>) attributes {dimension_semantics = [#tpu.dimension_semantics<parallel>], iteration_bounds = array<i64: 1>, scalar_prefetch = 0 : i64, scratch_operands = 0 : i64, tpu.core_type = #tpu.core_type<tc>, window_params = [{transform_indices = @transform_0, window_bounds = array<i64: 17>}, {transform_indices = @transform_1, window_bounds = array<i64: 2, 8, 128>}, {transform_indices = @transform_2, window_bounds = array<i64: 8, 128>}]} {
    %c0 = arith.constant 0 : index
    %c0_0 = arith.constant 0 : index
    %c0_1 = arith.constant 0 : index
    %0 = vector.load %arg2[%c0, %c0_0, %c0_1] : memref<2x8x128xf32, #tpu.memory_space<vmem>>, vector<1x8x128xf32>
    %1 = vector.shape_cast %0 : vector<1x8x128xf32> to vector<8x128xf32>
    %c1 = arith.constant 1 : index
    %c0_2 = arith.constant 0 : index
    %c0_3 = arith.constant 0 : index
    %2 = vector.load %arg2[%c1, %c0_2, %c0_3] : memref<2x8x128xf32, #tpu.memory_space<vmem>>, vector<1x8x128xf32>
    %3 = vector.shape_cast %2 : vector<1x8x128xf32> to vector<8x128xf32>
    %c16 = arith.constant 16 : index
    %4 = memref.load %arg1[%c16] : memref<17xf32, #tpu.memory_space<smem>>
    %5 = vector.broadcast %4 : f32 to vector<8x128xf32>
    %c0_4 = arith.constant 0 : index
    %6 = memref.load %arg1[%c0_4] : memref<17xf32, #tpu.memory_space<smem>>
    %7 = vector.broadcast %6 : f32 to vector<8x128xf32>
    %8 = arith.mulf %1, %7 : vector<8x128xf32>
    %c1_5 = arith.constant 1 : index
    %9 = memref.load %arg1[%c1_5] : memref<17xf32, #tpu.memory_space<smem>>
    %10 = vector.broadcast %9 : f32 to vector<8x128xf32>
    %11 = arith.mulf %3, %10 : vector<8x128xf32>
    %12 = arith.addf %8, %11 : vector<8x128xf32>
    %c8 = arith.constant 8 : index
    %13 = memref.load %arg1[%c8] : memref<17xf32, #tpu.memory_space<smem>>
    %14 = vector.broadcast %13 : f32 to vector<8x128xf32>
    %15 = arith.addf %12, %14 : vector<8x128xf32>
    %cst = arith.constant 0.000000e+00 : f32
    %16 = vector.broadcast %cst : f32 to vector<8x128xf32>
    %17 = arith.maximumf %15, %16 : vector<8x128xf32>
    %c12 = arith.constant 12 : index
    %18 = memref.load %arg1[%c12] : memref<17xf32, #tpu.memory_space<smem>>
    %19 = vector.broadcast %18 : f32 to vector<8x128xf32>
    %20 = arith.mulf %17, %19 : vector<8x128xf32>
    %21 = arith.addf %5, %20 : vector<8x128xf32>
    %c2 = arith.constant 2 : index
    %22 = memref.load %arg1[%c2] : memref<17xf32, #tpu.memory_space<smem>>
    %23 = vector.broadcast %22 : f32 to vector<8x128xf32>
    %24 = arith.mulf %1, %23 : vector<8x128xf32>
    %c3 = arith.constant 3 : index
    %25 = memref.load %arg1[%c3] : memref<17xf32, #tpu.memory_space<smem>>
    %26 = vector.broadcast %25 : f32 to vector<8x128xf32>
    %27 = arith.mulf %3, %26 : vector<8x128xf32>
    %28 = arith.addf %24, %27 : vector<8x128xf32>
    %c9 = arith.constant 9 : index
    %29 = memref.load %arg1[%c9] : memref<17xf32, #tpu.memory_space<smem>>
    %30 = vector.broadcast %29 : f32 to vector<8x128xf32>
    %31 = arith.addf %28, %30 : vector<8x128xf32>
    %cst_6 = arith.constant 0.000000e+00 : f32
    %32 = vector.broadcast %cst_6 : f32 to vector<8x128xf32>
    %33 = arith.maximumf %31, %32 : vector<8x128xf32>
    %c13 = arith.constant 13 : index
    %34 = memref.load %arg1[%c13] : memref<17xf32, #tpu.memory_space<smem>>
    %35 = vector.broadcast %34 : f32 to vector<8x128xf32>
    %36 = arith.mulf %33, %35 : vector<8x128xf32>
    %37 = arith.addf %21, %36 : vector<8x128xf32>
    %c4 = arith.constant 4 : index
    %38 = memref.load %arg1[%c4] : memref<17xf32, #tpu.memory_space<smem>>
    %39 = vector.broadcast %38 : f32 to vector<8x128xf32>
    %40 = arith.mulf %1, %39 : vector<8x128xf32>
    %c5 = arith.constant 5 : index
    %41 = memref.load %arg1[%c5] : memref<17xf32, #tpu.memory_space<smem>>
    %42 = vector.broadcast %41 : f32 to vector<8x128xf32>
    %43 = arith.mulf %3, %42 : vector<8x128xf32>
    %44 = arith.addf %40, %43 : vector<8x128xf32>
    %c10 = arith.constant 10 : index
    %45 = memref.load %arg1[%c10] : memref<17xf32, #tpu.memory_space<smem>>
    %46 = vector.broadcast %45 : f32 to vector<8x128xf32>
    %47 = arith.addf %44, %46 : vector<8x128xf32>
    %cst_7 = arith.constant 0.000000e+00 : f32
    %48 = vector.broadcast %cst_7 : f32 to vector<8x128xf32>
    %49 = arith.maximumf %47, %48 : vector<8x128xf32>
    %c14 = arith.constant 14 : index
    %50 = memref.load %arg1[%c14] : memref<17xf32, #tpu.memory_space<smem>>
    %51 = vector.broadcast %50 : f32 to vector<8x128xf32>
    %52 = arith.mulf %49, %51 : vector<8x128xf32>
    %53 = arith.addf %37, %52 : vector<8x128xf32>
    %c6 = arith.constant 6 : index
    %54 = memref.load %arg1[%c6] : memref<17xf32, #tpu.memory_space<smem>>
    %55 = vector.broadcast %54 : f32 to vector<8x128xf32>
    %56 = arith.mulf %1, %55 : vector<8x128xf32>
    %c7 = arith.constant 7 : index
    %57 = memref.load %arg1[%c7] : memref<17xf32, #tpu.memory_space<smem>>
    %58 = vector.broadcast %57 : f32 to vector<8x128xf32>
    %59 = arith.mulf %3, %58 : vector<8x128xf32>
    %60 = arith.addf %56, %59 : vector<8x128xf32>
    %c11 = arith.constant 11 : index
    %61 = memref.load %arg1[%c11] : memref<17xf32, #tpu.memory_space<smem>>
    %62 = vector.broadcast %61 : f32 to vector<8x128xf32>
    %63 = arith.addf %60, %62 : vector<8x128xf32>
    %cst_8 = arith.constant 0.000000e+00 : f32
    %64 = vector.broadcast %cst_8 : f32 to vector<8x128xf32>
    %65 = arith.maximumf %63, %64 : vector<8x128xf32>
    %c15 = arith.constant 15 : index
    %66 = memref.load %arg1[%c15] : memref<17xf32, #tpu.memory_space<smem>>
    %67 = vector.broadcast %66 : f32 to vector<8x128xf32>
    %68 = arith.mulf %65, %67 : vector<8x128xf32>
    %69 = arith.addf %53, %68 : vector<8x128xf32>
    %cst_9 = arith.constant 0.000000e+00 : f32
    %70 = vector.broadcast %cst_9 : f32 to vector<8x128xf32>
    %71 = arith.subf %70, %69 : vector<8x128xf32>
    %72 = math.exp %71 : vector<8x128xf32>
    %cst_10 = arith.constant 1.000000e+00 : f32
    %73 = vector.broadcast %cst_10 : f32 to vector<8x128xf32>
    %74 = arith.addf %73, %72 : vector<8x128xf32>
    %75 = tpu.reciprocal %74 {approx = true} : vector<8x128xf32> -> vector<8x128xf32>
    %c0_11 = arith.constant 0 : index
    %c0_12 = arith.constant 0 : index
    %76 = vector.load %arg3[%c0_11, %c0_12] : memref<8x128xf32, #tpu.memory_space<vmem>>, vector<8x128xf32>
    tpu.vector_store %arg3[%c0_11, %c0_12], %75 {strides = array<i32>} : memref<8x128xf32, #tpu.memory_space<vmem>>, vector<8x128xf32>,
    return
  }
  func.func @transform_0(%arg0: i32) -> i32 {
    %c0_i32 = arith.constant 0 : i32
    %c0_i32_0 = arith.constant 0 : i32
    return %c0_i32 : i32
  }
  func.func @transform_1(%arg0: i32) -> (i32, i32, i32) {
    %c0_i32 = arith.constant 0 : i32
    %c0_i32_0 = arith.constant 0 : i32
    %c0_i32_1 = arith.constant 0 : i32
    return %c0_i32, %arg0, %c0_i32_0 : i32, i32, i32
  }
  func.func @transform_2(%arg0: i32) -> (i32, i32) {
    %c0_i32 = arith.constant 0 : i32
    %c0_i32_0 = arith.constant 0 : i32
    return %arg0, %c0_i32 : i32, i32
  }
}

</mosaic_0001>

<bundles_post_ra>
// kernel: neural_network_forward.1
= control target key start
LH: loop header
LB: loop body
LE: loop exit
PB: predicated region body
PF: predicated region fallthrough
CT: control target
= control target key end

     0   :  { %7 = vsyncpa [#allocation3], 0  ;;  %s188_s0 = inlined_call_operand.vmem [shape: f32[17], index: 0, kind: input, shape index: {}]   ;;  %s189_s1 = inlined_call_operand.vmem [shape: f32[2,8,128], index: 1, kind: input, shape index: {}]   ;;  %s190_s2 = inlined_call_operand.vmem [shape: f32[8,128], index: 2, kind: output, shape index: {}]  }
   0x1   :  { %s14_s11 = sshll.u32 %s188_s0, 4  ;;  %s15_s11 = int_to_ptr.vmem [resolvable:$true] %s14_s11 }
   0x2   :  { %s122_s12 = scalar_lea.vmem %s15_s11, 16  ;;  %p127_p1 = scmp.lt.s32.totalorder %s15_s11, %s15_s11 }
   0x3   :  { %p123_p0 = scmp.ne.s32.totalorder %s15_s11, %s122_s12  ;;  %p128_p2 = scmp.lt.s32.totalorder %s122_s12, %s122_s12 }
   0x5   :  { %p129_p3 = por %p128_p2, %p127_p1 }
   0x7   :  { %p130_p4 = pnand %p129_p3, %p123_p0 }
   0x9   :  { %133 = shalt.err (!%p130_p4)
}
   0xa   :  { %s136_s13 = smov [#allocation2]  }
   0xb   :  { %17 = dma.vmem_to_smem %s15_s11, 16, %s136_s13, [#allocation3]  }
   0xc   :  { %134 = dma.done.wait [#allocation3], 16  }
   0xd   :  { %135 = vsyncadd [#allocation3], 4294967280 }
   0xe   :  { %23 = sfence }
   0xf   :  { %s29_s14 = sld [smem:[#allocation2]]  ;;  %s102_s15 = sld [smem:[#allocation2 + $0x1]]  ;;  %v24_v0 = vld [vmem:[%s189_s1] sm:$0xff]  ;;  %v100_v1 = vld [vmem:[%s189_s1 + $0x8] sm:$0xff] }
  0x10   :  { %s155_s16 = sld [smem:[#allocation2 + $0x8]]  ;;  %s105_s17 = sld [smem:[#allocation2 + $0x2]] }
  0x11   :  { %s106_s18 = sld [smem:[#allocation2 + $0x3]]  ;;  %s157_s0 = sld [smem:[#allocation2 + $0x9]] }
  0x12   :  { %s162_s21 = sld [smem:[#allocation2 + $0xc]]  ;;  %s110_s25 = sld [smem:[#allocation2 + $0x5]] }
  0x13   :  { %s109_s22 = sld [smem:[#allocation2 + $0x4]]  ;;  %s167_s26 = sld [smem:[#allocation2 + $0xa]] }
  0x14   :  { %s169_s27 = sld [smem:[#allocation2 + $0x10]]  ;;  %s113_s28 = sld [smem:[#allocation2 + $0x6]] }
  0x15   :  { %v30_v2 = vstv %s29_s14  ;;  %v33_v4 = vstv %s102_s15  ;;  %s171_s29 = sld [smem:[#allocation2 + $0xd]]  ;;  %s114_s30 = sld [smem:[#allocation2 + $0x7]] }
  0x16   :  { %v31_v3 = vmul.f32 %v30_v2, %v24_v0  ;;  %v34_v5 = vmul.f32 %v100_v1, %v33_v4  ;;  %v45_v6 = vstv %s105_s17  ;;  %s173_s3 = sld [smem:[#allocation2 + $0xb]]  ;;  %v37_v7 = vstv %s155_s16  ;;  %s176_s1 = sld [smem:[#allocation2 + $0xe]] }
  0x17   :  { %v46_v8 = vmul.f32 %v45_v6, %v24_v0  ;;  %v48_v9 = vstv %s106_s18  ;;  %v52_v13 = vstv %s157_s0  ;;  %s116_s4 = sld [smem:[#allocation2 + $0xf]] }
  0x18   :  { %v35_v10 = vadd.f32 %v34_v5, %v31_v3  ;;  %v49_v11 = vmul.f32 %v100_v1, %v48_v9  ;;  %v63_v15 = vstv %s110_s25  ;;  %v41_v19 = vstv %s162_s21 }
  0x19   :  { %v60_v12 = vstv %s109_s22  ;;  %v64_v18 = vmul.f32 %v100_v1, %v63_v15  ;;  %v67_v20 = vstv %s167_s26 }
  0x1a   :  { %v61_v14 = vmul.f32 %v60_v12, %v24_v0  ;;  %v38_v16 = vadd.f32 %v37_v7, %v35_v10  ;;  %v50_v17 = vadd.f32 %v49_v11, %v46_v8  ;;  %v75_v21 = vstv %s113_s28 }
  0x1b   :  { %v78_v22 = vstv %s114_s30  ;;  %v76_v26 = vmul.f32 %v75_v21, %v24_v0  ;;  %v28_v27 = vstv %s169_s27  ;;  %v56_v28 = vstv %s171_s29 }
  0x1c   :  { %v39_v23 = vmax.f32 %v38_v16, 0.0  ;;  %v53_v24 = vadd.f32 %v52_v13, %v50_v17  ;;  %v65_v25 = vadd.f32 %v64_v18, %v61_v14  ;;  %v79_v29 = vmul.f32 %v100_v1, %v78_v22 }
  0x1d   :  { %v82_v33 = vstv %s173_s3  ;;  %v71_v34 = vstv %s176_s1  ;;  %v86_v42 = vstv %s116_s4 }
  0x1e   :  { %v42_v30 = vmul.f32 %v41_v19, %v39_v23  ;;  %v54_v31 = vmax.f32 %v53_v24, 0.0  ;;  %v68_v32 = vadd.f32 %v67_v20, %v65_v25  ;;  %v80_v35 = vadd.f32 %v79_v29, %v76_v26 }
  0x20   :  { %v43_v36 = vadd.f32 %v42_v30, %v28_v27  ;;  %v57_v37 = vmul.f32 %v56_v28, %v54_v31  ;;  %v69_v38 = vmax.f32 %v68_v32, 0.0  ;;  %v83_v39 = vadd.f32 %v82_v33, %v80_v35 }
  0x22   :  { %v58_v40 = vadd.f32 %v57_v37, %v43_v36  ;;  %v72_v41 = vmul.f32 %v71_v34, %v69_v38  ;;  %v84_v43 = vmax.f32 %v83_v39, 0.0 }
  0x24   :  { %v73_v44 = vadd.f32 %v72_v41, %v58_v40  ;;  %v87_v45 = vmul.f32 %v86_v42, %v84_v43 }
  0x26   :  { %v88_v46 = vadd.f32 %v87_v45, %v73_v44 }
  0x28   :  { %v89_v47 = vsub.f32 0.0, %v88_v46 }
  0x2a   :  { %v90_v48 = vmul.f32 1.442695, %v89_v47 }
  0x2c   :  { %118 = vpow2.f32 %v90_v48 }
  0x36   :  { %v119_v49 = vpop.eup %118 }
  0x37   :  { %v92_v50 = vadd.f32 1.0, %v119_v49 }
  0x39   :  { %120 = vrcp.f32 %v92_v50 }
  0x43   :  { %v121_v51 = vpop.eup %120 }
  0x44   :  { %94 = vst [vmem:[%s190_s2] sm:$0xff] %v121_v51 }
  0x45   :  { %99 = vsyncpa [#allocation3], 1 }

</bundles_post_ra>
